<compile_context>
chip_gen: v6e
topology: v6e:2x2x1
jax: 0.10.0
libtpu: 0.0.40
codegen_flags: <defaults>
</compile_context>

<pallas_src>
import math

import jax
import jax.numpy as jnp
import numpy as np
from jax.experimental import pallas as pl
from jax.experimental.pallas import tpu as pltpu


def fusion_kernel(txt_ref, gph_ref, w_txt_ref, w_gph_ref, b_ref, out_ref):
    # Accumulate and add the bias in f32; cast once on store (out dtype may be bf16).
    acc = jnp.dot(txt_ref[...], w_txt_ref[...], preferred_element_type=jnp.float32)
    acc = acc + jnp.dot(gph_ref[...], w_gph_ref[...], preferred_element_type=jnp.float32)
    out_ref[...] = (acc + b_ref[...]).astype(out_ref.dtype)


def precompose_params(torch_params, *, weight_dtype=jnp.float32):
    """Fold the entire (purely affine) forward into 2 matrices + 1 bias.

    `torch_params` uses the ORIGINAL PyTorch layouts of the module:
      wt [E, E],  bt [E]        : text_proj   (Linear weight is [out, in])
      wg [E, G],  bg [E]        : graph_proj
      w_in [3E,E], b_in [3E]    : attn.in_proj (Q/K/V stacked; only V matters)
      wo [E, E],  bo [E]        : attn.out_proj
      wp [E, 2E], bp [E]        : proj
    Composition is done in float64 on the host (one-time cost).
    Precondition: eval-mode MHA (dropout == 0), as in the module's forward spec.
    """
    wt, bt, wg, bg, w_in, b_in, wo, bo, wp, bp = torch_params
    E = int(wt.shape[0])
    f64 = lambda a: np.asarray(a, dtype=np.float64)
    Wt, Wg, Wo, Wp = f64(wt), f64(wg), f64(wo), f64(wp)
    bt_, bg_, bo_, bp_ = f64(bt), f64(bg), f64(bo), f64(bp)
    Wv = f64(w_in)[2 * E:3 * E]       # only the V slice reaches the output (seq len 1)
    bv = f64(b_in)[2 * E:3 * E]
    Wp1, Wp2 = Wp[:, :E], Wp[:, E:]   # proj halves acting on o1 / o2

    chain = Wv.T @ Wo.T                           # value-proj then out-proj, [E, E]
    A_txt = Wt.T @ chain @ Wp2.T                  # txt -> o2 -> 2nd half of proj
    A_gph = Wg.T @ chain @ Wp1.T                  # gph -> o1 -> 1st half of proj
    b_o = bv @ Wo.T + bo_                         # attention-path bias (same for o1/o2)
    b_eff = (bg_ @ chain + b_o) @ Wp1.T + (bt_ @ chain + b_o) @ Wp2.T + bp_

    # No lane padding: store the true feature width E (masked vst beats 4x the
    # HBM write traffic + an extra slice pass when E << 128; moot if E % 128 == 0).
    w_txt = jnp.asarray(A_txt, dtype=weight_dtype)            # [Tdim, E]
    w_gph = jnp.asarray(A_gph, dtype=weight_dtype)            # [Gdim, E]
    b_fused = jnp.asarray(b_eff[None, :], dtype=jnp.float32)  # bias stays f32
    return w_txt, w_gph, b_fused


def _tpu_vmem_capacity_bytes():
    try:
        return int(pltpu.get_tpu_info().vmem_capacity_bytes)
    except Exception:
        return 64 << 20   # conservative (v7x-sized) fallback


def _pick_block_b(B, tdim, gdim, out_dim, act_itemsize, out_itemsize, vmem_budget):
    """Batch tile: sublane multiple matching the activation dtype packing
    (8 f32 / 16 bf16 / 32 int8-fp8), ~512-1024 rows for large B, an EVEN number
    of grid steps (>=2 when B allows) so v7x's two TensorCores split evenly,
    and small enough that the double-buffered activation+output tiles fit the
    per-generation VMEM budget (weights are a few KiB and don't matter)."""
    mult = {1: 32, 2: 16}.get(act_itemsize, 8)
    if B <= mult:
        return B
    bytes_per_row = 2 * ((tdim + gdim) * act_itemsize + out_dim * out_itemsize)
    max_rows = max(mult, (vmem_budget // bytes_per_row) // mult * mult)
    cap = min(1024, max_rows)
    k = max(2, -(-B // cap))          # number of grid steps
    if k % 2:
        k += 1                        # even split across the two TCs (v7x)
    blk = -(-B // k)
    blk = ((blk + mult - 1) // mult) * mult
    return max(mult, min(blk, B))


def cross_modal_fusion(txt, gph, fused_params, *, block_b=None, out_dtype=None):
    """txt: [B, Tdim], gph: [B, Gdim] -> fused [B, Tdim] (same math as the module).

    Output dtype follows the activation dtype by default (bf16 in -> bf16 out),
    keeping the dominant HBM write stream as narrow as the inputs; the
    accumulate + bias add stay f32 inside the kernel.
    """
    w_txt, w_gph, b_fused = fused_params
    B, tdim = txt.shape
    gdim = gph.shape[1]
    out_dim = w_txt.shape[1]
    if out_dtype is None:
        out_dtype = txt.dtype

    act_itemsize = jnp.dtype(txt.dtype).itemsize
    out_itemsize = jnp.dtype(out_dtype).itemsize

    # Per-generation VMEM budgeting (v5e/v6e: 128 MiB physical, v7x: 64 MiB).
    vmem_cap = _tpu_vmem_capacity_bytes()
    vmem_budget = int(min(max(vmem_cap // 8, 8 << 20), 32 << 20))

    if block_b is None:
        block_b = _pick_block_b(B, tdim, gdim, out_dim,
                                act_itemsize, out_itemsize, vmem_budget)
    n_blocks = pl.cdiv(B, block_b)

    weight_bytes = (w_txt.size * w_txt.dtype.itemsize
                    + w_gph.size * w_gph.dtype.itemsize
                    + b_fused.size * b_fused.dtype.itemsize)
    act_bytes = (txt.size * act_itemsize
                 + gph.size * jnp.dtype(gph.dtype).itemsize)
    out_bytes = B * out_dim * out_itemsize
    cost = pl.CostEstimate(flops=2 * B * (tdim + gdim) * out_dim,
                           transcendentals=0,
                           bytes_accessed=act_bytes + weight_bytes + out_bytes)

    vmem_limit = int(min(vmem_budget + weight_bytes + (2 << 20),
                         max(vmem_cap // 2, 16 << 20)))

    out = pl.pallas_call(
        fusion_kernel,
        out_shape=jax.ShapeDtypeStruct((B, out_dim), out_dtype),
        grid=(n_blocks,),
        in_specs=[
            pl.BlockSpec((block_b, tdim), lambda i: (i, 0)),
            pl.BlockSpec((block_b, gdim), lambda i: (i, 0)),
            pl.BlockSpec(w_txt.shape, lambda i: (0, 0)),     # weights resident every step
            pl.BlockSpec(w_gph.shape, lambda i: (0, 0)),
            pl.BlockSpec(b_fused.shape, lambda i: (0, 0)),
        ],
        out_specs=pl.BlockSpec((block_b, out_dim), lambda i: (i, 0)),
        compiler_params=pltpu.CompilerParams(
            dimension_semantics=("parallel",),
            vmem_limit_bytes=vmem_limit),
        cost_estimate=cost,
    )(txt, gph, w_txt, w_gph, b_fused)
    return out


if __name__ == "__main__":
    B, TDIM, GDIM, HEADS = 8, 32, 48, 4   # text_dim=32 (num_heads=4 divides it)

    key = jax.random.PRNGKey(0)
    ks = jax.random.split(key, 12)
    txt = jax.random.normal(ks[0], (B, TDIM), jnp.float32)
    gph = jax.random.normal(ks[1], (B, GDIM), jnp.float32)

    def init(k, shape, fan_in):
        bound = 1.0 / math.sqrt(fan_in)
        return jax.random.uniform(k, shape, jnp.float32, -bound, bound)

    # Parameters in the ORIGINAL PyTorch layouts ([out, in] for Linear weights).
    wt, bt = init(ks[2], (TDIM, TDIM), TDIM), init(ks[3], (TDIM,), TDIM)
    wg, bg = init(ks[4], (TDIM, GDIM), GDIM), init(ks[5], (TDIM,), GDIM)
    w_in = init(ks[6], (3 * TDIM, TDIM), TDIM)
    b_in = init(ks[7], (3 * TDIM,), TDIM)
    wo, bo = init(ks[8], (TDIM, TDIM), TDIM), init(ks[9], (TDIM,), TDIM)
    wp, bp = init(ks[10], (TDIM, 2 * TDIM), 2 * TDIM), init(ks[11], (TDIM,), 2 * TDIM)
    torch_params = (wt, bt, wg, bg, w_in, b_in, wo, bo, wp, bp)

    # ---- pure-JAX reference of the ORIGINAL forward (full MHA incl. softmax) ----
    def mha_seq1(q, kv):
        Wq, Wk, Wv = w_in[:TDIM], w_in[TDIM:2 * TDIM], w_in[2 * TDIM:]
        bq, bk, bv = b_in[:TDIM], b_in[TDIM:2 * TDIM], b_in[2 * TDIM:]
        Q, K, V = q @ Wq.T + bq, kv @ Wk.T + bk, kv @ Wv.T + bv
        hd = TDIM // HEADS
        Qh, Kh, Vh = (x.reshape(B, HEADS, hd) for x in (Q, K, V))
        scores = jnp.sum(Qh * Kh, -1, keepdims=True) / math.sqrt(hd)  # single key
        attn = jax.nn.softmax(scores, axis=-1)                        # == 1
        return (attn * Vh).reshape(B, TDIM) @ wo.T + bo

    txt_up = txt @ wt.T + bt
    gph_up = gph @ wg.T + bg
    o1 = mha_seq1(txt_up, gph_up)
    o2 = mha_seq1(gph_up, txt_up)
    ref = jnp.concatenate([o1, o2], axis=-1) @ wp.T + bp

    # ---- Pallas kernel, f32 ----
    fused_f32 = precompose_params(torch_params, weight_dtype=jnp.float32)
    out = jax.block_until_ready(cross_modal_fusion(txt, gph, fused_f32))
    assert out.shape == (B, TDIM) and out.dtype == jnp.float32
    np.testing.assert_allclose(np.asarray(out), np.asarray(ref), rtol=2e-4, atol=2e-5)

    # ---- bf16 activations/weights/OUTPUT (default fast path on v6e/v7x):
    #      halves both HBM streams; accumulation and bias add stay f32 inside ----
    fused_bf16 = (fused_f32[0].astype(jnp.bfloat16),
                  fused_f32[1].astype(jnp.bfloat16),
                  fused_f32[2])                                  # bias stays f32
    out16 = jax.block_until_ready(
        cross_modal_fusion(txt.astype(jnp.bfloat16), gph.astype(jnp.bfloat16), fused_bf16))
    assert out16.shape == (B, TDIM) and out16.dtype == jnp.bfloat16
    np.testing.assert_allclose(np.asarray(out16, dtype=np.float32), np.asarray(ref),
                               rtol=1e-1, atol=5e-2)

    print("KERNEL_OK")
</pallas_src>

<mosaic_0001>
module attributes {stable_mosaic.version = 11 : i64} {
  func.func @fusion_kernel(%arg0: i32, %arg1: memref<8x32xf32, #tpu.memory_space<vmem>>, %arg2: memref<8x48xf32, #tpu.memory_space<vmem>>, %arg3: memref<32x32xf32, #tpu.memory_space<vmem>>, %arg4: memref<48x32xf32, #tpu.memory_space<vmem>>, %arg5: memref<1x32xf32, #tpu.memory_space<vmem>>, %arg6: memref<8x32xf32, #tpu.memory_space<vmem>>) attributes {dimension_semantics = [#tpu.dimension_semantics<parallel>], iteration_bounds = array<i64: 1>, scalar_prefetch = 0 : i64, scratch_operands = 0 : i64, tpu.core_type = #tpu.core_type<tc>, window_params = [{transform_indices = @transform_0, window_bounds = array<i64: 8, 32>}, {transform_indices = @transform_1, window_bounds = array<i64: 8, 48>}, {pipeline_mode = #tpu.pipeline_mode<synchronous>, transform_indices = @transform_2, window_bounds = array<i64: 32, 32>}, {pipeline_mode = #tpu.pipeline_mode<synchronous>, transform_indices = @transform_3, window_bounds = array<i64: 48, 32>}, {pipeline_mode = #tpu.pipeline_mode<synchronous>, transform_indices = @transform_4, window_bounds = array<i64: 1, 32>}, {transform_indices = @transform_5, window_bounds = array<i64: 8, 32>}]} {
    %c0 = arith.constant 0 : index
    %c0_0 = arith.constant 0 : index
    %0 = vector.load %arg1[%c0, %c0_0] : memref<8x32xf32, #tpu.memory_space<vmem>>, vector<8x32xf32>
    %c0_1 = arith.constant 0 : index
    %c0_2 = arith.constant 0 : index
    %1 = vector.load %arg3[%c0_1, %c0_2] : memref<32x32xf32, #tpu.memory_space<vmem>>, vector<32x32xf32>
    %cst = arith.constant dense<0.000000e+00> : vector<8x32xf32>
    %2 = tpu.matmul %0, %1, %cst {dimension_numbers = #tpu.dot_dimension_numbers<[1], [0], [0], [1], [0, 0, 1, 1], [], []>} : vector<8x32xf32>, vector<32x32xf32>, vector<8x32xf32> -> vector<8x32xf32>
    %c0_3 = arith.constant 0 : index
    %c0_4 = arith.constant 0 : index
    %3 = vector.load %arg2[%c0_3, %c0_4] : memref<8x48xf32, #tpu.memory_space<vmem>>, vector<8x48xf32>
    %c0_5 = arith.constant 0 : index
    %c0_6 = arith.constant 0 : index
    %4 = vector.load %arg4[%c0_5, %c0_6] : memref<48x32xf32, #tpu.memory_space<vmem>>, vector<48x32xf32>
    %cst_7 = arith.constant dense<0.000000e+00> : vector<8x32xf32>
    %5 = tpu.matmul %3, %4, %cst_7 {dimension_numbers = #tpu.dot_dimension_numbers<[1], [0], [0], [1], [0, 0, 1, 1], [], []>} : vector<8x48xf32>, vector<48x32xf32>, vector<8x32xf32> -> vector<8x32xf32>
    %6 = arith.addf %2, %5 : vector<8x32xf32>
    %c0_8 = arith.constant 0 : index
    %c0_9 = arith.constant 0 : index
    %7 = vector.load %arg5[%c0_8, %c0_9] : memref<1x32xf32, #tpu.memory_space<vmem>>, vector<1x32xf32>
    %8 = vector.broadcast %7 : vector<1x32xf32> to vector<8x32xf32>
    %9 = arith.addf %6, %8 : vector<8x32xf32>
    %c0_10 = arith.constant 0 : index
    %c0_11 = arith.constant 0 : index
    %10 = vector.load %arg6[%c0_10, %c0_11] : memref<8x32xf32, #tpu.memory_space<vmem>>, vector<8x32xf32>
    tpu.vector_store %arg6[%c0_10, %c0_11], %9 {strides = array<i32>} : memref<8x32xf32, #tpu.memory_space<vmem>>, vector<8x32xf32>,
    return
  }
  func.func @transform_0(%arg0: i32) -> (i32, i32) {
    %c0_i32 = arith.constant 0 : i32
    %c0_i32_0 = arith.constant 0 : i32
    return %arg0, %c0_i32 : i32, i32
  }
  func.func @transform_1(%arg0: i32) -> (i32, i32) {
    %c0_i32 = arith.constant 0 : i32
    %c0_i32_0 = arith.constant 0 : i32
    return %arg0, %c0_i32 : i32, i32
  }
  func.func @transform_2(%arg0: i32) -> (i32, i32) {
    %c0_i32 = arith.constant 0 : i32
    %c0_i32_0 = arith.constant 0 : i32
    %c0_i32_1 = arith.constant 0 : i32
    return %c0_i32, %c0_i32_0 : i32, i32
  }
  func.func @transform_3(%arg0: i32) -> (i32, i32) {
    %c0_i32 = arith.constant 0 : i32
    %c0_i32_0 = arith.constant 0 : i32
    %c0_i32_1 = arith.constant 0 : i32
    return %c0_i32, %c0_i32_0 : i32, i32
  }
  func.func @transform_4(%arg0: i32) -> (i32, i32) {
    %c0_i32 = arith.constant 0 : i32
    %c0_i32_0 = arith.constant 0 : i32
    %c0_i32_1 = arith.constant 0 : i32
    return %c0_i32, %c0_i32_0 : i32, i32
  }
  func.func @transform_5(%arg0: i32) -> (i32, i32) {
    %c0_i32 = arith.constant 0 : i32
    %c0_i32_0 = arith.constant 0 : i32
    return %arg0, %c0_i32 : i32, i32
  }
}

</mosaic_0001>

<bundles_post_ra>
// kernel: tpu_custom_call.1
= control target key start
LH: loop header
LB: loop body
LE: loop exit
PB: predicated region body
PF: predicated region fallthrough
CT: control target
= control target key end

     0   :  { %v270_v2 = vmov 0.0   ;;  %s347_s0 = inlined_call_operand.vmem [shape: f32[8,32], index: 0, kind: input, shape index: {}]   ;;  %s348_s1 = inlined_call_operand.vmem [shape: f32[8,48], index: 1, kind: input, shape index: {}]   ;;  %s349_s2 = inlined_call_operand.vmem [shape: f32[32,32], index: 2, kind: input, shape index: {}]   ;;  %s350_s3 = inlined_call_operand.vmem [shape: f32[48,32], index: 3, kind: input, shape index: {}]   ;;  %s351_s4 = inlined_call_operand.vmem [shape: f32[1,32], index: 4, kind: input, shape index: {}]   ;;  %s352_s5 = inlined_call_operand.hbm [shape: f32[8,32], index: 5, kind: output, shape index: {}]  }
   0x1   :  { %v32_v0 = vld [vmem:[%s350_s3 + $0x28] sm:$0xff]  ;;  %v25_v1 = vld [vmem:[%s349_s2 + $0x18] sm:$0xff]  ;;  %219 = vmatprep.subr.mxu0 %v270_v2  ;;  %234 = vmatprep.subr.mxu1 %v270_v2  ;;  %v31_v3 = vld [vmem:[%s350_s3 + $0x20] sm:$0xff] }
   0x2   :  { %v24_v4 = vld [vmem:[%s349_s2 + $0x10] sm:$0xff]  ;;  %220 = vmatpush3.msra.mxu0 %v32_v0  ;;  %235 = vmatpush3.msra.mxu1 %v25_v1  ;;  %v30_v5 = vld [vmem:[%s350_s3 + $0x18] sm:$0xff]  ;;  %v23_v6 = vld [vmem:[%s349_s2 + $0x8] sm:$0xff] }
   0x3   :  { %221 = vmatprep.subr.mxu0 %v270_v2  ;;  %236 = vmatprep.subr.mxu1 %v270_v2 }
   0x4   :  { %222 = vmatpush3.msra.mxu0 %v31_v3  ;;  %237 = vmatpush3.msra.mxu1 %v24_v4 }
   0x5   :  { %10 = vsyncpa [#allocation3], 0  ;;  %223 = vmatprep.subr.mxu0 %v270_v2  ;;  %238 = vmatprep.subr.mxu1 %v270_v2  ;;  %v29_v7 = vld [vmem:[%s350_s3 + $0x10] sm:$0xff]  ;;  %v22_v8 = vld [vmem:[%s349_s2] sm:$0xff]  ;;  %vm107_vm0 = vcmask 261120   ;;  %vm271_vm1 = vmmov 0  }
   0x6   :  { %224 = vmatpush3.msra.mxu0 %v30_v5  ;;  %239 = vmatpush3.msra.mxu1 %v23_v6  ;;  %v28_v9 = vld [vmem:[%s350_s3 + $0x8] sm:$0xff]  ;;  %v21_v10 = vld [vmem:[%s347_s0] sm:$0xff]  ;;  %vm33_vm2 = vcmask 392192  }
   0x7   :  { %225 = vmatprep.subr.mxu0 %v270_v2  ;;  %240 = vmatprep.subr.mxu1 %v270_v2  ;;  %v27_v11 = vld [vmem:[%s350_s3] sm:$0xff]  ;;  %s272_s3 = smov [#allocation2]  }
   0x8   :  { %226 = vmatpush3.msra.mxu0 %v29_v7  ;;  %241 = vmatpush3.msra.mxu1 %v22_v8  ;;  %v26_v12 = vld [vmem:[%s348_s1] sm:$0xff]  ;;  %s196_s17 = sshll.u32 %s272_s3, 4  ;;  %s197_s17 = int_to_ptr.vmem [resolvable:$true] %s196_s17 }
   0x9   :  { %227 = vmatprep.subr.mxu0 %v270_v2  ;;  %242 = vmatprep.mubr.msk.f32.mxu1 %vm271_vm1, %v270_v2  ;;  %v206_v16 = vld [vmem:[%s351_s4] ss:$0 sm:$0xff]  ;;  %s248_s1 = scalar_lea.vmem %s197_s17, 128  ;;  %p253_p1 = scmp.lt.s32.totalorder %s197_s17, %s197_s17 }
   0xa   :  { %228 = vmatpush3.msra.mxu0 %v28_v9  ;;  %243 = vmatmul.mubr.msk.f32.vlgmr.msra.gmra.mxu1 %vm107_vm0, %v21_v10  ;;  %p249_p0 = scmp.ne.s32.totalorder %s197_s17, %s248_s1  ;;  %p254_p2 = scmp.lt.s32.totalorder %s248_s1, %s248_s1 }
   0xb   :  { %229 = vmatprep.subr.mxu0 %v270_v2  ;;  %231 = vmatprep.mubr.msk.f32.mxu0 %vm271_vm1, %v270_v2 }
   0xc   :  { %230 = vmatpush3.msra.mxu0 %v27_v11  ;;  %p255_p3 = por %p254_p2, %p253_p1 }
   0xd   :  { %232 = vmatmul.mubr.msk.f32.vlgmr.msra.gmra.mxu0 %vm33_vm2, %v26_v12 }
   0xe   :  { %p256_p4 = pnand %p255_p3, %p249_p0 }
  0xca   :  { %v177_v13 = vpop.f32.mrf.mxu1 }
  0xcc   :  { %v244_v14 = vpop.f32.mrf.mxu1 }
  0xcd   :  { %v103_v15 = vpop.f32.mrf.mxu0 }
  0xce   :  { %v178_v17 = vadd.f32 %v177_v13, %v103_v15 }
  0xcf   :  { %v233_v18 = vpop.f32.mrf.mxu0 }
  0xd0   :  { %v188_v19 = vadd.f32 %v206_v16, %v178_v17 }
  0xd2   :  { %189 = vst.msk [vmem:[#allocation2] sm:$0xff] %vm107_vm0, %v188_v19 }
  0xd3   :  { %259 = shalt.err (!%p256_p4)
}
  0xd4   :  { %199 = dma.vmem_to_hbm [thread:$0]  %s197_s17, 128, %s352_s5, [#allocation3]  }
  0xd5   :  { %268 = dma.done.wait [#allocation3], 128  }
  0xd6   :  { %269 = vsyncadd [#allocation3], 4294967168 }
  0xd7   :  { %203 = vsyncpa [#allocation3], 1 }

</bundles_post_ra>
